<compile_context>
chip_gen: v7x
topology: tpu7x:2x2x1
jax: 0.10.0
libtpu: 0.0.40
codegen_flags: <defaults>
</compile_context>

<pallas_src>
import functools

import jax
import jax.numpy as jnp
from jax.experimental import pallas as pl
from jax.experimental.pallas import tpu as pltpu

NEG_SLOPE = 0.01

IN_F = 310            # CFE input features (kept unpadded on the DMA path)
H1, H2, H3 = 256, 128, 64
H3_PAD = 128          # layer-3 features zero-padded 64 -> 128 (lane-dense)
C_PAD = 128           # classifier logits zero-padded to 128 lanes


def _leaky_relu(x):
    return jnp.where(x > 0, x, NEG_SLOPE * x)


def _round_up(n, m):
    return ((n + m - 1) // m) * m


def _pick_tile(bp):
    """Rows per grid step.

    Aim for ~4 grid steps (pipelining) and at least 2 steps (v7x has two
    TensorCores sharding the "parallel" axis) whenever the batch allows it,
    capped at 512 rows/step which is VMEM-safe on every generation.
    """
    if bp <= 8:
        return 8
    return max(8, min(512, _round_up(-(-bp // 4), 8)))


# ----------------------------------------------------------------------------
# Fused kernel: CFE (3 matmuls + LeakyReLU) + classifier, one batch tile/step.
# ----------------------------------------------------------------------------
def deepcoral_kernel(x_ref, w1_ref, b1_ref, w2_ref, b2_ref, w3_ref, b3_ref,
                     wc_ref, bc_ref, o_ref):
    dt = w1_ref.dtype  # MXU operand dtype (bf16 by default, f32 optional)

    # Layer 1: 310 -> 256. x is cast to the compute dtype here (in-kernel),
    # so the wrapper never touches/pads the activations.
    h = jnp.dot(x_ref[...].astype(dt), w1_ref[...],
                preferred_element_type=jnp.float32)
    h = _leaky_relu(h + b1_ref[...]).astype(dt)          # biases stay f32

    # Layer 2: 256 -> 128
    h = jnp.dot(h, w2_ref[...], preferred_element_type=jnp.float32)
    h = _leaky_relu(h + b2_ref[...]).astype(dt)

    # Layer 3: 128 -> 128 (zero-padded from 64; padded cols stay exactly 0)
    h = jnp.dot(h, w3_ref[...], preferred_element_type=jnp.float32)
    h = _leaky_relu(h + b3_ref[...]).astype(dt)

    # Classifier: 128 -> 128 (zero-padded from num_category)
    out = jnp.dot(h, wc_ref[...], preferred_element_type=jnp.float32)
    o_ref[...] = (out + bc_ref[...]).astype(o_ref.dtype)


def _fused_forward(x, w1, b1, w2, b2, w3, b3, wc, bc, *, tb, out_dtype):
    """x: [Bp, IN_F] (Bp multiple of 8). Returns [Bp, C_PAD] in out_dtype."""
    Bp = x.shape[0]
    grid = (pl.cdiv(Bp, tb),)            # ragged last block allowed

    # Weights/biases: constant index_map -> fetched once, VMEM-resident.
    const = lambda i: (0, 0)

    return pl.pallas_call(
        deepcoral_kernel,
        grid=grid,
        out_shape=jax.ShapeDtypeStruct((Bp, C_PAD), out_dtype),
        in_specs=[
            pl.BlockSpec((tb, IN_F), lambda i: (i, 0)),   # x tile (unpadded 310 lanes)
            pl.BlockSpec((IN_F, H1), const),              # W1
            pl.BlockSpec((1, H1), const),                 # b1 (f32)
            pl.BlockSpec((H1, H2), const),                # W2
            pl.BlockSpec((1, H2), const),                 # b2 (f32)
            pl.BlockSpec((H2, H3_PAD), const),            # W3 (col-padded)
            pl.BlockSpec((1, H3_PAD), const),             # b3 (f32, col-padded)
            pl.BlockSpec((H3_PAD, C_PAD), const),         # Wc (row+col padded)
            pl.BlockSpec((1, C_PAD), const),              # bc (f32, col-padded)
        ],
        out_specs=pl.BlockSpec((tb, C_PAD), lambda i: (i, 0)),
        compiler_params=pltpu.CompilerParams(
            dimension_semantics=("parallel",)),
    )(x, w1, b1, w2, b2, w3, b3, wc, bc)


# ----------------------------------------------------------------------------
# One-time parameter preparation (hoisted out of the per-call forward).
# ----------------------------------------------------------------------------
def prepare_params(params, compute_dtype=jnp.bfloat16):
    """Pad/cast weights once. Biases stay f32 (no avoidable quantization)."""
    cd = compute_dtype
    C = params["wc"].shape[1]
    w3_p = jnp.pad(params["w3"], ((0, 0), (0, H3_PAD - H3)))
    b3_p = jnp.pad(params["b3"], ((0, 0), (0, H3_PAD - H3)))
    wc_p = jnp.pad(params["wc"], ((0, H3_PAD - H3), (0, C_PAD - C)))
    bc_p = jnp.pad(params["bc"], ((0, 0), (0, C_PAD - C)))
    return dict(
        w1=params["w1"].astype(cd), b1=params["b1"].astype(jnp.float32),
        w2=params["w2"].astype(cd), b2=params["b2"].astype(jnp.float32),
        w3=w3_p.astype(cd),         b3=b3_p.astype(jnp.float32),
        wc=wc_p.astype(cd),         bc=bc_p.astype(jnp.float32),
    )


# ----------------------------------------------------------------------------
# Public forward (eval mode): returns (data_src_cls [B, C], loss == 0.0)
# ----------------------------------------------------------------------------
@functools.partial(jax.jit, static_argnames=("num_category",))
def deepcoral_forward(prepared, data_src, num_category=4):
    B = data_src.shape[0]
    Bp = _round_up(B, 8)
    tb = _pick_tile(Bp)

    # Only pad the batch to the next multiple of 8 (<=7 dead rows); the last
    # grid block may be ragged (OOB rows dropped on store).
    x = data_src if Bp == B else jnp.pad(data_src, ((0, Bp - B), (0, 0)))

    out_dtype = prepared["w1"].dtype
    out_p = _fused_forward(
        x,
        prepared["w1"], prepared["b1"],
        prepared["w2"], prepared["b2"],
        prepared["w3"], prepared["b3"],
        prepared["wc"], prepared["bc"],
        tb=tb, out_dtype=out_dtype,
    )

    data_src_cls = out_p[:B, :num_category].astype(jnp.float32)
    loss = jnp.zeros((), jnp.float32)   # eval path: CORAL loss not computed
    return data_src_cls, loss


# ----------------------------------------------------------------------------
# Parameter construction (PyTorch-style U(-1/sqrt(fan_in), 1/sqrt(fan_in)))
# ----------------------------------------------------------------------------
def _linear_params(key, fan_in, fan_out):
    kw, kb = jax.random.split(key)
    bound = 1.0 / jnp.sqrt(float(fan_in))
    w = jax.random.uniform(kw, (fan_in, fan_out), jnp.float32, -bound, bound)
    b = jax.random.uniform(kb, (1, fan_out), jnp.float32, -bound, bound)
    return w, b


def init_deepcoral_params(key, number_of_category=4):
    k1, k2, k3, k4 = jax.random.split(key, 4)
    w1, b1 = _linear_params(k1, IN_F, H1)
    w2, b2 = _linear_params(k2, H1, H2)
    w3, b3 = _linear_params(k3, H2, H3)
    wc, bc = _linear_params(k4, H3, number_of_category)
    return dict(w1=w1, b1=b1, w2=w2, b2=b2, w3=w3, b3=b3, wc=wc, bc=bc)


# ----------------------------------------------------------------------------
# Plain-JAX reference for sanity checks
# ----------------------------------------------------------------------------
def deepcoral_reference(params, x):
    h = _leaky_relu(x @ params["w1"] + params["b1"])
    h = _leaky_relu(h @ params["w2"] + params["b2"])
    h = _leaky_relu(h @ params["w3"] + params["b3"])
    return h @ params["wc"] + params["bc"]


if __name__ == "__main__":
    key = jax.random.PRNGKey(0)
    k_params, k_data, k_data2 = jax.random.split(key, 3)

    B = 8                    # batch
    C = 4                    # number_of_category

    params = init_deepcoral_params(k_params, number_of_category=C)
    data_src = jax.random.normal(k_data, (B, IN_F), jnp.float32)
    ref = deepcoral_reference(params, data_src)

    # f32 compute path: exact parity with the plain-JAX reference.
    prep_f32 = prepare_params(params, compute_dtype=jnp.float32)
    pred, loss = deepcoral_forward(prep_f32, data_src, num_category=C)
    pred = jax.block_until_ready(pred)
    assert pred.shape == (B, C), pred.shape
    assert jnp.allclose(pred, ref, atol=1e-4, rtol=1e-4), "f32 mismatch vs reference"
    assert float(loss) == 0.0

    # Multi-step grid + batch pad + ragged last block path (B=36 -> Bp=40,
    # tb=16, 3 grid steps, last block partially out-of-bounds).
    B2 = 36
    data_src2 = jax.random.normal(k_data2, (B2, IN_F), jnp.float32)
    ref2 = deepcoral_reference(params, data_src2)
    pred2, _ = deepcoral_forward(prep_f32, data_src2, num_category=C)
    pred2 = jax.block_until_ready(pred2)
    assert pred2.shape == (B2, C)
    assert jnp.allclose(pred2, ref2, atol=1e-4, rtol=1e-4), "ragged-grid mismatch"

    # Default bf16 MXU-operand path (f32 accumulation): loose check.
    prep_bf16 = prepare_params(params)               # bf16 by default
    pred_bf16, _ = deepcoral_forward(prep_bf16, data_src, num_category=C)
    pred_bf16 = jax.block_until_ready(pred_bf16)
    assert pred_bf16.shape == (B, C)
    assert jnp.allclose(pred_bf16, ref, atol=2e-1, rtol=2e-1), "bf16 drift too large"

    print("KERNEL_OK")
</pallas_src>

<mosaic_0001>
module attributes {stable_mosaic.version = 11 : i64} {
  func.func @deepcoral_kernel(%arg0: i32, %arg1: memref<8x310xf32, #tpu.memory_space<vmem>>, %arg2: memref<310x256xf32, #tpu.memory_space<vmem>>, %arg3: memref<1x256xf32, #tpu.memory_space<vmem>>, %arg4: memref<256x128xf32, #tpu.memory_space<vmem>>, %arg5: memref<1x128xf32, #tpu.memory_space<vmem>>, %arg6: memref<128x128xf32, #tpu.memory_space<vmem>>, %arg7: memref<1x128xf32, #tpu.memory_space<vmem>>, %arg8: memref<128x128xf32, #tpu.memory_space<vmem>>, %arg9: memref<1x128xf32, #tpu.memory_space<vmem>>, %arg10: memref<8x128xf32, #tpu.memory_space<vmem>>) attributes {dimension_semantics = [#tpu.dimension_semantics<parallel>], iteration_bounds = array<i64: 1>, scalar_prefetch = 0 : i64, scratch_operands = 0 : i64, tpu.core_type = #tpu.core_type<tc>, window_params = [{transform_indices = @transform_0, window_bounds = array<i64: 8, 310>}, {pipeline_mode = #tpu.pipeline_mode<synchronous>, transform_indices = @transform_1, window_bounds = array<i64: 310, 256>}, {pipeline_mode = #tpu.pipeline_mode<synchronous>, transform_indices = @transform_2, window_bounds = array<i64: 1, 256>}, {pipeline_mode = #tpu.pipeline_mode<synchronous>, transform_indices = @transform_3, window_bounds = array<i64: 256, 128>}, {pipeline_mode = #tpu.pipeline_mode<synchronous>, transform_indices = @transform_4, window_bounds = array<i64: 1, 128>}, {pipeline_mode = #tpu.pipeline_mode<synchronous>, transform_indices = @transform_5, window_bounds = array<i64: 128, 128>}, {pipeline_mode = #tpu.pipeline_mode<synchronous>, transform_indices = @transform_6, window_bounds = array<i64: 1, 128>}, {pipeline_mode = #tpu.pipeline_mode<synchronous>, transform_indices = @transform_7, window_bounds = array<i64: 128, 128>}, {pipeline_mode = #tpu.pipeline_mode<synchronous>, transform_indices = @transform_8, window_bounds = array<i64: 1, 128>}, {transform_indices = @transform_9, window_bounds = array<i64: 8, 128>}]} {
    %c0 = arith.constant 0 : index
    %c0_0 = arith.constant 0 : index
    %0 = vector.load %arg1[%c0, %c0_0] : memref<8x310xf32, #tpu.memory_space<vmem>>, vector<8x310xf32>
    %c0_1 = arith.constant 0 : index
    %c0_2 = arith.constant 0 : index
    %1 = vector.load %arg2[%c0_1, %c0_2] : memref<310x256xf32, #tpu.memory_space<vmem>>, vector<310x256xf32>
    %cst = arith.constant dense<0.000000e+00> : vector<8x256xf32>
    %2 = tpu.matmul %0, %1, %cst {dimension_numbers = #tpu.dot_dimension_numbers<[1], [0], [0], [1], [0, 0, 1, 1], [], []>} : vector<8x310xf32>, vector<310x256xf32>, vector<8x256xf32> -> vector<8x256xf32>
    %c0_3 = arith.constant 0 : index
    %c0_4 = arith.constant 0 : index
    %3 = vector.load %arg3[%c0_3, %c0_4] : memref<1x256xf32, #tpu.memory_space<vmem>>, vector<1x256xf32>
    %4 = vector.broadcast %3 : vector<1x256xf32> to vector<8x256xf32>
    %5 = arith.addf %2, %4 : vector<8x256xf32>
    %cst_5 = arith.constant 0.000000e+00 : f32
    %6 = vector.broadcast %cst_5 : f32 to vector<8x256xf32>
    %7 = arith.cmpf ogt, %5, %6 : vector<8x256xf32>
    %cst_6 = arith.constant 0.00999999977 : f32
    %8 = vector.broadcast %cst_6 : f32 to vector<8x256xf32>
    %9 = arith.mulf %8, %5 : vector<8x256xf32>
    %10 = arith.select %7, %5, %9 : vector<8x256xi1>, vector<8x256xf32>
    %c0_7 = arith.constant 0 : index
    %c0_8 = arith.constant 0 : index
    %11 = vector.load %arg4[%c0_7, %c0_8] : memref<256x128xf32, #tpu.memory_space<vmem>>, vector<256x128xf32>
    %cst_9 = arith.constant dense<0.000000e+00> : vector<8x128xf32>
    %12 = tpu.matmul %10, %11, %cst_9 {dimension_numbers = #tpu.dot_dimension_numbers<[1], [0], [0], [1], [0, 0, 1, 1], [], []>} : vector<8x256xf32>, vector<256x128xf32>, vector<8x128xf32> -> vector<8x128xf32>
    %c0_10 = arith.constant 0 : index
    %c0_11 = arith.constant 0 : index
    %13 = vector.load %arg5[%c0_10, %c0_11] : memref<1x128xf32, #tpu.memory_space<vmem>>, vector<1x128xf32>
    %14 = vector.broadcast %13 : vector<1x128xf32> to vector<8x128xf32>
    %15 = arith.addf %12, %14 : vector<8x128xf32>
    %cst_12 = arith.constant 0.000000e+00 : f32
    %16 = vector.broadcast %cst_12 : f32 to vector<8x128xf32>
    %17 = arith.cmpf ogt, %15, %16 : vector<8x128xf32>
    %cst_13 = arith.constant 0.00999999977 : f32
    %18 = vector.broadcast %cst_13 : f32 to vector<8x128xf32>
    %19 = arith.mulf %18, %15 : vector<8x128xf32>
    %20 = arith.select %17, %15, %19 : vector<8x128xi1>, vector<8x128xf32>
    %c0_14 = arith.constant 0 : index
    %c0_15 = arith.constant 0 : index
    %21 = vector.load %arg6[%c0_14, %c0_15] : memref<128x128xf32, #tpu.memory_space<vmem>>, vector<128x128xf32>
    %cst_16 = arith.constant dense<0.000000e+00> : vector<8x128xf32>
    %22 = tpu.matmul %20, %21, %cst_16 {dimension_numbers = #tpu.dot_dimension_numbers<[1], [0], [0], [1], [0, 0, 1, 1], [], []>} : vector<8x128xf32>, vector<128x128xf32>, vector<8x128xf32> -> vector<8x128xf32>
    %c0_17 = arith.constant 0 : index
    %c0_18 = arith.constant 0 : index
    %23 = vector.load %arg7[%c0_17, %c0_18] : memref<1x128xf32, #tpu.memory_space<vmem>>, vector<1x128xf32>
    %24 = vector.broadcast %23 : vector<1x128xf32> to vector<8x128xf32>
    %25 = arith.addf %22, %24 : vector<8x128xf32>
    %cst_19 = arith.constant 0.000000e+00 : f32
    %26 = vector.broadcast %cst_19 : f32 to vector<8x128xf32>
    %27 = arith.cmpf ogt, %25, %26 : vector<8x128xf32>
    %cst_20 = arith.constant 0.00999999977 : f32
    %28 = vector.broadcast %cst_20 : f32 to vector<8x128xf32>
    %29 = arith.mulf %28, %25 : vector<8x128xf32>
    %30 = arith.select %27, %25, %29 : vector<8x128xi1>, vector<8x128xf32>
    %c0_21 = arith.constant 0 : index
    %c0_22 = arith.constant 0 : index
    %31 = vector.load %arg8[%c0_21, %c0_22] : memref<128x128xf32, #tpu.memory_space<vmem>>, vector<128x128xf32>
    %cst_23 = arith.constant dense<0.000000e+00> : vector<8x128xf32>
    %32 = tpu.matmul %30, %31, %cst_23 {dimension_numbers = #tpu.dot_dimension_numbers<[1], [0], [0], [1], [0, 0, 1, 1], [], []>} : vector<8x128xf32>, vector<128x128xf32>, vector<8x128xf32> -> vector<8x128xf32>
    %c0_24 = arith.constant 0 : index
    %c0_25 = arith.constant 0 : index
    %33 = vector.load %arg9[%c0_24, %c0_25] : memref<1x128xf32, #tpu.memory_space<vmem>>, vector<1x128xf32>
    %34 = vector.broadcast %33 : vector<1x128xf32> to vector<8x128xf32>
    %35 = arith.addf %32, %34 : vector<8x128xf32>
    %c0_26 = arith.constant 0 : index
    %c0_27 = arith.constant 0 : index
    %36 = vector.load %arg10[%c0_26, %c0_27] : memref<8x128xf32, #tpu.memory_space<vmem>>, vector<8x128xf32>
    tpu.vector_store %arg10[%c0_26, %c0_27], %35 {strides = array<i32>} : memref<8x128xf32, #tpu.memory_space<vmem>>, vector<8x128xf32>,
    return
  }
  func.func @transform_0(%arg0: i32) -> (i32, i32) {
    %c0_i32 = arith.constant 0 : i32
    %c0_i32_0 = arith.constant 0 : i32
    return %arg0, %c0_i32 : i32, i32
  }
  func.func @transform_1(%arg0: i32) -> (i32, i32) {
    %c0_i32 = arith.constant 0 : i32
    %c0_i32_0 = arith.constant 0 : i32
    %c0_i32_1 = arith.constant 0 : i32
    return %c0_i32, %c0_i32_0 : i32, i32
  }
  func.func @transform_2(%arg0: i32) -> (i32, i32) {
    %c0_i32 = arith.constant 0 : i32
    %c0_i32_0 = arith.constant 0 : i32
    %c0_i32_1 = arith.constant 0 : i32
    return %c0_i32, %c0_i32_0 : i32, i32
  }
  func.func @transform_3(%arg0: i32) -> (i32, i32) {
    %c0_i32 = arith.constant 0 : i32
    %c0_i32_0 = arith.constant 0 : i32
    %c0_i32_1 = arith.constant 0 : i32
    return %c0_i32, %c0_i32_0 : i32, i32
  }
  func.func @transform_4(%arg0: i32) -> (i32, i32) {
    %c0_i32 = arith.constant 0 : i32
    %c0_i32_0 = arith.constant 0 : i32
    %c0_i32_1 = arith.constant 0 : i32
    return %c0_i32, %c0_i32_0 : i32, i32
  }
  func.func @transform_5(%arg0: i32) -> (i32, i32) {
    %c0_i32 = arith.constant 0 : i32
    %c0_i32_0 = arith.constant 0 : i32
    %c0_i32_1 = arith.constant 0 : i32
    return %c0_i32, %c0_i32_0 : i32, i32
  }
  func.func @transform_6(%arg0: i32) -> (i32, i32) {
    %c0_i32 = arith.constant 0 : i32
    %c0_i32_0 = arith.constant 0 : i32
    %c0_i32_1 = arith.constant 0 : i32
    return %c0_i32, %c0_i32_0 : i32, i32
  }
  func.func @transform_7(%arg0: i32) -> (i32, i32) {
    %c0_i32 = arith.constant 0 : i32
    %c0_i32_0 = arith.constant 0 : i32
    %c0_i32_1 = arith.constant 0 : i32
    return %c0_i32, %c0_i32_0 : i32, i32
  }
  func.func @transform_8(%arg0: i32) -> (i32, i32) {
    %c0_i32 = arith.constant 0 : i32
    %c0_i32_0 = arith.constant 0 : i32
    %c0_i32_1 = arith.constant 0 : i32
    return %c0_i32, %c0_i32_0 : i32, i32
  }
  func.func @transform_9(%arg0: i32) -> (i32, i32) {
    %c0_i32 = arith.constant 0 : i32
    %c0_i32_0 = arith.constant 0 : i32
    return %arg0, %c0_i32 : i32, i32
  }
}

</mosaic_0001>

<bundles_post_ra>
// kernel: deepcoral_forward.1
= control target key start
LH: loop header
LB: loop body
LE: loop exit
PB: predicated region body
PF: predicated region fallthrough
CT: control target
= control target key end

     0   :  { %14 = vsyncpa [#allocation3], 0  ;;  %s1228_s0 = inlined_call_operand.vmem [shape: f32[8,310], index: 0, kind: input, shape index: {}]   ;;  %s1229_s1 = inlined_call_operand.hbm [shape: f32[310,256], index: 1, kind: input, shape index: {}]   ;;  %s1230_s2 = inlined_call_operand.vmem [shape: f32[1,256], index: 2, kind: input, shape index: {}]   ;;  %s1231_s3 = inlined_call_operand.hbm [shape: f32[256,128], index: 3, kind: input, shape index: {}]   ;;  %s1232_s4 = inlined_call_operand.vmem [shape: f32[1,128], index: 4, kind: input, shape index: {}]   ;;  %s1233_s5 = inlined_call_operand.hbm [shape: f32[128,128], index: 5, kind: input, shape index: {}]   ;;  %s1234_s6 = inlined_call_operand.vmem [shape: f32[1,128], index: 6, kind: input, shape index: {}]   ;;  %s1235_s7 = inlined_call_operand.hbm [shape: f32[128,128], index: 7, kind: input, shape index: {}]   ;;  %s1236_s8 = inlined_call_operand.vmem [shape: f32[1,128], index: 8, kind: input, shape index: {}]   ;;  %s1237_s9 = inlined_call_operand.vmem [shape: f32[8,128], index: 9, kind: output, shape index: {}]  }
   0x1   :  { %15 = vsyncpa [#allocation5], 0 }
   0x2   :  { %16 = vsyncpa [#allocation8], 0  ;;  %s1058_s30 = smov [#allocation4]   ;;  %s964_s13 = scalar_lea.hbm %s1231_s3, 4096 }
   0x3   :  { %s38_s10 = sshll.u32 %s1058_s30, 4  ;;  %p965_p0 = scmp.ne.s32.totalorder %s1231_s3, %s964_s13  ;;  %s39_s10 = int_to_ptr.vmem [resolvable:$true] %s38_s10 }
   0x4   :  { %p968_p1 = scmp.lt.u32.totalorder %s964_s13, %s1231_s3 }
   0x6   :  { %p970_p2 = pnand %p968_p1, %p965_p0 }
   0x8   :  { %973 = shalt.err (!%p970_p2)
}
   0x9   :  { %s974_s18 = scalar_lea.vmem %s39_s10, 4096  ;;  %p979_p4 = scmp.lt.s32.totalorder %s39_s10, %s39_s10 }
   0xa   :  { %p975_p3 = scmp.ne.s32.totalorder %s39_s10, %s974_s18  ;;  %p980_p5 = scmp.lt.s32.totalorder %s974_s18, %s974_s18 }
   0xc   :  { %p981_p6 = por %p980_p5, %p979_p4 }
   0xe   :  { %p982_p7 = pnand %p981_p6, %p975_p3 }
  0x10   :  { %985 = shalt.err (!%p982_p7)
}
  0x11   :  { %s1059_s19 = smov 128   ;;  %s1060_s20 = smov 8  }
  0x12   :  { %44 = dma.hbm_to_vmem [thread:$0]  %s1231_s3, 4096, %s39_s10, [#allocation5], %s1059_s19, %s1059_s19, %s1060_s20  }
  0x13   :  { %s1061_s23 = smov [#allocation2]   ;;  %s986_s27 = scalar_lea.hbm %s1229_s1, 9984 }
  0x14   :  { %s24_s24 = sshll.u32 %s1061_s23, 4  ;;  %p987_p8 = scmp.ne.s32.totalorder %s1229_s1, %s986_s27  ;;  %s25_s24 = int_to_ptr.vmem [resolvable:$true] %s24_s24 }
  0x15   :  { %p990_p9 = scmp.lt.u32.totalorder %s986_s27, %s1229_s1 }
  0x17   :  { %p992_p10 = pnand %p990_p9, %p987_p8 }
  0x19   :  { %995 = shalt.err (!%p992_p10)
}
  0x1a   :  { %s996_s12 = scalar_lea.vmem %s25_s24, 9984  ;;  %p1001_p12 = scmp.lt.s32.totalorder %s25_s24, %s25_s24 }
  0x1b   :  { %p997_p11 = scmp.ne.s32.totalorder %s25_s24, %s996_s12  ;;  %p1002_p13 = scmp.lt.s32.totalorder %s996_s12, %s996_s12 }
  0x1d   :  { %p1003_p0 = por %p1002_p13, %p1001_p12 }
  0x1f   :  { %p1004_p1 = pnand %p1003_p0, %p997_p11 }
  0x21   :  { %1007 = shalt.err (!%p1004_p1)
}
  0x22   :  { %s1062_s3 = smov 256   ;;  %s1063_s10 = smov 16  }
  0x23   :  { %30 = dma.hbm_to_vmem [thread:$0]  %s1229_s1, 9984, %s25_s24, [#allocation3], %s1062_s3, %s1062_s3, %s1063_s10  }
  0x24   :  { %s1064_s15 = smov [#allocation6]   ;;  %s1065_s17 = smov [#allocation7]  }
  0x25   :  { %s52_s16 = sshll.u32 %s1064_s15, 4  ;;  %s66_s18 = sshll.u32 %s1065_s17, 4  ;;  %s53_s16 = int_to_ptr.vmem [resolvable:$true] %s52_s16  ;;  %s1146_s18 = int_to_ptr.vmem [resolvable:$true] %s66_s18 }
  0x26   :  { %s1008_s23 = scalar_lea.hbm %s1233_s5, 2048 }
  0x27   :  { %p1009_p2 = scmp.ne.s32.totalorder %s1233_s5, %s1008_s23  ;;  %p1012_p3 = scmp.lt.u32.totalorder %s1008_s23, %s1233_s5 }
  0x29   :  { %p1014_p4 = pnand %p1012_p3, %p1009_p2 }
  0x2b   :  { %1017 = shalt.err (!%p1014_p4)
}
  0x2c   :  { %s1018_s1 = scalar_lea.vmem %s53_s16, 2048  ;;  %p1023_p6 = scmp.lt.s32.totalorder %s53_s16, %s53_s16 }
  0x2d   :  { %p1019_p5 = scmp.ne.s32.totalorder %s53_s16, %s1018_s1  ;;  %p1024_p7 = scmp.lt.s32.totalorder %s1018_s1, %s1018_s1 }
  0x2f   :  { %p1025_p8 = por %p1024_p7, %p1023_p6 }
  0x31   :  { %p1026_p9 = pnand %p1025_p8, %p1019_p5 }
  0x33   :  { %1029 = shalt.err (!%p1026_p9)
}
  0x34   :  { %58 = dma.hbm_to_vmem [thread:$0]  %s1233_s5, 2048, %s53_s16, [#allocation5], %s1059_s19, %s1059_s19, %s1060_s20  }
  0x35   :  { %s1030_s12 = scalar_lea.hbm %s1235_s7, 2048 }
  0x36   :  { %p1031_p10 = scmp.ne.s32.totalorder %s1235_s7, %s1030_s12  ;;  %p1034_p11 = scmp.lt.u32.totalorder %s1030_s12, %s1235_s7 }
  0x38   :  { %p1036_p12 = pnand %p1034_p11, %p1031_p10 }
  0x3a   :  { %1039 = shalt.err (!%p1036_p12)
}
  0x3b   :  { %s1040_s15 = scalar_lea.vmem %s1146_s18, 2048  ;;  %p1045_p0 = scmp.lt.s32.totalorder %s1146_s18, %s1146_s18 }
  0x3c   :  { %p1041_p13 = scmp.ne.s32.totalorder %s1146_s18, %s1040_s15  ;;  %p1046_p1 = scmp.lt.s32.totalorder %s1040_s15, %s1040_s15 }
  0x3e   :  { %p1047_p2 = por %p1046_p1, %p1045_p0 }
  0x40   :  { %p1048_p3 = pnand %p1047_p2, %p1041_p13 }
  0x42   :  { %1051 = shalt.err (!%p1048_p3)
}
  0x43   :  { %72 = dma.hbm_to_vmem [thread:$0]  %s1235_s7, 2048, %s1146_s18, [#allocation8], %s1059_s19, %s1059_s19, %s1060_s20  }
  0x44   :  { %1052 = dma.done.wait [#allocation3], 9984  }
  0x45   :  { %1053 = vsyncadd [#allocation3], 4294957312 }
  0x46   :  { %1054 = dma.done.wait [#allocation5], 6144  }
  0x47   :  { %1055 = vsyncadd [#allocation5], 4294961152 }
  0x48   :  { %1056 = dma.done.wait [#allocation8], 2048  }
  0x49   :  { %1057 = vsyncadd [#allocation8], 4294965248  ;;  %v91_v0 = vld [vmem:[#allocation2 + $0x8] sm:$0xff]  ;;  %v93_v1 = vld [vmem:[#allocation2 + $0x18] sm:$0xff]  ;;  %vm184_vm0 = vcmask 1045504   ;;  %vm180_vm1 = vcmask 441344  }
  0x4a   :  { %v90_v2 = vld [vmem:[#allocation2] sm:$0xff]  ;;  %v793_v3 = vpack.c.bf16 %v93_v1, %v91_v0  ;;  %v92_v4 = vld [vmem:[#allocation2 + $0x10] sm:$0xff]  ;;  %v95_v5 = vld [vmem:[#allocation2 + $0x28] sm:$0xff]  ;;  %vm1068_vm4 = vmmov 0  }
  0x4b   :  { %v97_v6 = vld [vmem:[#allocation2 + $0x38] sm:$0xff]  ;;  %v795_v7 = vpack.c.bf16 %v92_v4, %v90_v2  ;;  %v94_v9 = vld [vmem:[#allocation2 + $0x20] sm:$0xff]  ;;  %v96_v10 = vld [vmem:[#allocation2 + $0x30] sm:$0xff] }
  0x4c   :  { %v797_v8 = vpack.c.bf16 %v97_v6, %v95_v5  ;;  %v99_v11 = vld [vmem:[#allocation2 + $0x48] sm:$0xff]  ;;  %794 = vmatprep.subr.bf16.mxu0 %v793_v3  ;;  %v101_v12 = vld [vmem:[#allocation2 + $0x58] sm:$0xff]  ;;  %v799_v13 = vpack.c.bf16 %v96_v10, %v94_v9  ;;  %v98_v15 = vld [vmem:[#allocation2 + $0x40] sm:$0xff] }
  0x4d   :  { %796 = vmatpush1.bf16.msra.mxu0 %v795_v7  ;;  %v801_v14 = vpack.c.bf16 %v101_v12, %v99_v11  ;;  %v100_v16 = vld [vmem:[#allocation2 + $0x50] sm:$0xff]  ;;  %v103_v17 = vld [vmem:[#allocation2 + $0x68] sm:$0xff]  ;;  %v105_v18 = vld [vmem:[#allocation2 + $0x78] sm:$0xff] }
  0x4e   :  { %798 = vmatprep.subr.bf16.mxu0 %v797_v8  ;;  %v803_v19 = vpack.c.bf16 %v100_v16, %v98_v15  ;;  %v805_v20 = vpack.c.bf16 %v105_v18, %v103_v17  ;;  %v102_v21 = vld [vmem:[#allocation2 + $0x60] sm:$0xff]  ;;  %v104_v22 = vld [vmem:[#allocation2 + $0x70] sm:$0xff]  ;;  %v107_v23 = vld [vmem:[#allocation2 + $0x88] sm:$0xff] }
  0x4f   :  { %v109_v24 = vld [vmem:[#allocation2 + $0x98] sm:$0xff]  ;;  %v807_v25 = vpack.c.bf16 %v104_v22, %v102_v21  ;;  %v106_v27 = vld [vmem:[#allocation2 + $0x80] sm:$0xff]  ;;  %v108_v28 = vld [vmem:[#allocation2 + $0x90] sm:$0xff] }
  0x50   :  { %v809_v26 = vpack.c.bf16 %v109_v24, %v107_v23  ;;  %v111_v29 = vld [vmem:[#allocation2 + $0xa8] sm:$0xff]  ;;  %v113_v30 = vld [vmem:[#allocation2 + $0xb8] sm:$0xff]  ;;  %v811_v31 = vpack.c.bf16 %v108_v28, %v106_v27  ;;  %v110_v33 = vld [vmem:[#allocation2 + $0xa0] sm:$0xff] }
  0x51   :  { %800 = vmatpush1.bf16.msra.mxu0 %v799_v13  ;;  %v813_v32 = vpack.c.bf16 %v113_v30, %v111_v29  ;;  %v112_v34 = vld [vmem:[#allocation2 + $0xb0] sm:$0xff]  ;;  %v115_v35 = vld [vmem:[#allocation2 + $0xc8] sm:$0xff]  ;;  %v117_v36 = vld [vmem:[#allocation2 + $0xd8] sm:$0xff] }
  0x52   :  { %802 = vmatprep.subr.bf16.mxu0 %v801_v14  ;;  %v815_v37 = vpack.c.bf16 %v112_v34, %v110_v33  ;;  %v817_v38 = vpack.c.bf16 %v117_v36, %v115_v35  ;;  %v114_v39 = vld [vmem:[#allocation2 + $0xc0] sm:$0xff]  ;;  %v116_v40 = vld [vmem:[#allocation2 + $0xd0] sm:$0xff]  ;;  %v88_v41 = vld [vmem:[%s1228_s0 + $0x8] sm:$0xff] }
  0x53   :  { %v119_v42 = vld [vmem:[#allocation2 + $0xe8] sm:$0xff]  ;;  %v121_v43 = vld [vmem:[#allocation2 + $0xf8] sm:$0xff]  ;;  %255 = vmatprep.mubr.f32.mxu0 %v88_v41  ;;  %v819_v44 = vpack.c.bf16 %v116_v40, %v114_v39  ;;  %v118_v46 = vld [vmem:[#allocation2 + $0xe0] sm:$0xff] }
  0x54   :  { %v821_v45 = vpack.c.bf16 %v121_v43, %v119_v42  ;;  %v120_v47 = vld [vmem:[#allocation2 + $0xf0] sm:$0xff]  ;;  %v123_v48 = vld [vmem:[#allocation2 + $0x108] sm:$0xff]  ;;  %v125_v49 = vld [vmem:[#allocation2 + $0x118] sm:$0xff] }
  0x55   :  { %804 = vmatpush1.bf16.msra.mxu0 %v803_v19  ;;  %v122_v50 = vld [vmem:[#allocation2 + $0x100] sm:$0xff]  ;;  %v124_v51 = vld [vmem:[#allocation2 + $0x110] sm:$0xff]  ;;  %v356_v53 = vld [vmem:[#allocation4 + $0x88] sm:$0xff]  ;;  %v823_v55 = vpack.c.bf16 %v120_v47, %v118_v46  ;;  %v825_v60 = vpack.c.bf16 %v125_v49, %v123_v48 }
  0x56   :  { %806 = vmatprep.subr.bf16.mxu0 %v805_v20  ;;  %v355_v52 = vld [vmem:[#allocation4 + $0x80] sm:$0xff]  ;;  %v340_v57 = vld [vmem:[#allocation4 + $0x8] sm:$0xff]  ;;  %v357_v58 = vld [vmem:[#allocation4 + $0x90] sm:$0xff]  ;;  %v827_v6 = vpack.c.bf16 %v124_v51, %v122_v50 }
  0x57   :  { %v339_v54 = vld [vmem:[#allocation4] sm:$0xff]  ;;  %v869_v56 = vpack.c.bf16 %v356_v53, %v355_v52  ;;  %v358_v59 = vld [vmem:[#allocation4 + $0x98] sm:$0xff]  ;;  %v341_v63 = vld [vmem:[#allocation4 + $0x10] sm:$0xff] }
  0x58   :  { %v871_v61 = vpack.c.bf16 %v340_v57, %v339_v54  ;;  %v873_v62 = vpack.c.bf16 %v358_v59, %v357_v58  ;;  %v342_v0 = vld [vmem:[#allocation4 + $0x18] sm:$0xff]  ;;  %v359_v1 = vld [vmem:[#allocation4 + $0xa0] sm:$0xff]  ;;  %v129_v3 = vld [vmem:[#allocation2 + $0x138] sm:$0xff] }
  0x59   :  { %808 = vmatpush1.bf16.msra.mxu0 %v807_v25  ;;  %v127_v2 = vld [vmem:[#allocation2 + $0x128] sm:$0xff]  ;;  %870 = vmatprep.subr.bf16.mxu1 %v869_v56  ;;  %v360_v4 = vld [vmem:[#allocation4 + $0xa8] sm:$0xff]  ;;  %v875_v5 = vpack.c.bf16 %v342_v0, %v341_v63  ;;  %v126_v7 = vld [vmem:[#allocation2 + $0x120] sm:$0xff] }
  0x5a   :  { %810 = vmatprep.subr.bf16.mxu0 %v809_v26  ;;  %872 = vmatpush3.bf16.msra.mxu1 %v871_v61  ;;  %v877_v8 = vpack.c.bf16 %v360_v4, %v359_v1  ;;  %v343_v9 = vld [vmem:[#allocation4 + $0x20] sm:$0xff]  ;;  %v344_v10 = vld [vmem:[#allocation4 + $0x28] sm:$0xff]  ;;  %v829_v11 = vpack.c.bf16 %v129_v3, %v127_v2  ;;  %v361_v13 = vld [vmem:[#allocation4 + $0xb0] sm:$0xff] }
  0x5b   :  { %874 = vmatprep.subr.bf16.mxu1 %v873_v62  ;;  %v128_v12 = vld [vmem:[#allocation2 + $0x130] sm:$0xff]  ;;  %v362_v14 = vld [vmem:[#allocation4 + $0xb8] sm:$0xff]  ;;  %v133_v16 = vld [vmem:[#allocation2 + $0x158] sm:$0xff]  ;;  %v879_v17 = vpack.c.bf16 %v344_v10, %v343_v9 }
  0x5c   :  { %v131_v15 = vld [vmem:[#allocation2 + $0x148] sm:$0xff]  ;;  %v831_v18 = vpack.c.bf16 %v128_v12, %v126_v7  ;;  %v130_v19 = vld [vmem:[#allocation2 + $0x140] sm:$0xff]  ;;  %v881_v20 = vpack.c.bf16 %v362_v14, %v361_v13  ;;  %v132_v24 = vld [vmem:[#allocation2 + $0x150] sm:$0xff] }
  0x5d   :  { %812 = vmatpush1.bf16.msra.mxu0 %v811_v31  ;;  %v345_v21 = vld [vmem:[#allocation4 + $0x30] sm:$0xff]  ;;  %v346_v22 = vld [vmem:[#allocation4 + $0x38] sm:$0xff]  ;;  %v833_v23 = vpack.c.bf16 %v133_v16, %v131_v15  ;;  %v363_v25 = vld [vmem:[#allocation4 + $0xc0] sm:$0xff]  ;;  %v835_v30 = vpack.c.bf16 %v132_v24, %v130_v19 }
  0x5e   :  { %814 = vmatprep.subr.bf16.mxu0 %v813_v32  ;;  %876 = vmatpush3.bf16.msra.mxu1 %v875_v5  ;;  %v364_v26 = vld [vmem:[#allocation4 + $0xc8] sm:$0xff]  ;;  %v135_v27 = vld [vmem:[#allocation2 + $0x168] sm:$0xff]  ;;  %v883_v29 = vpack.c.bf16 %v346_v22, %v345_v21  ;;  %v134_v31 = vld [vmem:[#allocation2 + $0x160] sm:$0xff] }
  0x5f   :  { %878 = vmatprep.subr.bf16.mxu1 %v877_v8  ;;  %v137_v28 = vld [vmem:[#allocation2 + $0x178] sm:$0xff]  ;;  %v885_v32 = vpack.c.bf16 %v364_v26, %v363_v25  ;;  %v347_v33 = vld [vmem:[#allocation4 + $0x40] sm:$0xff]  ;;  %v139_v39 = vld [vmem:[#allocation2 + $0x188] sm:$0xff] }
  0x60   :  { %v348_v34 = vld [vmem:[#allocation4 + $0x48] sm:$0xff]  ;;  %v837_v35 = vpack.c.bf16 %v137_v28, %v135_v27  ;;  %v136_v36 = vld [vmem:[#allocation2 + $0x170] sm:$0xff]  ;;  %v138_v47 = vld [vmem:[#allocation2 + $0x180] sm:$0xff] }
  0x61   :  { %816 = vmatpush1.bf16.msra.mxu0 %v815_v37  ;;  %v365_v37 = vld [vmem:[#allocation4 + $0xd0] sm:$0xff]  ;;  %v141_v40 = vld [vmem:[#allocation2 + $0x198] sm:$0xff]  ;;  %v887_v41 = vpack.c.bf16 %v348_v34, %v347_v33  ;;  %v839_v42 = vpack.c.bf16 %v136_v36, %v134_v31  ;;  %v140_v48 = vld [vmem:[#allocation2 + $0x190] sm:$0xff] }
  0x62   :  { %818 = vmatprep.subr.bf16.mxu0 %v817_v38  ;;  %880 = vmatpush3.bf16.msra.mxu1 %v879_v17  ;;  %v366_v38 = vld [vmem:[#allocation4 + $0xd8] sm:$0xff]  ;;  %v841_v46 = vpack.c.bf16 %v141_v40, %v139_v39  ;;  %v145_v50 = vld [vmem:[#allocation2 + $0x1b8] sm:$0xff]  ;;  %v843_v52 = vpack.c.bf16 %v140_v48, %v138_v47  ;;  %v142_v54 = vld [vmem:[#allocation2 + $0x1a0] sm:$0xff]  ;;  %v1067_v40 = vmov 0.0|0.0  }
  0x63   :  { %882 = vmatprep.subr.bf16.mxu1 %v881_v20  ;;  %v889_v43 = vpack.c.bf16 %v366_v38, %v365_v37  ;;  %v143_v49 = vld [vmem:[#allocation2 + $0x1a8] sm:$0xff]  ;;  %v149_v57 = vld [vmem:[#allocation2 + $0x1d8] sm:$0xff]  ;;  %v148_v61 = vld [vmem:[#allocation2 + $0x1d0] sm:$0xff]  ;;  %v1066_v20 = vmov 0.0  }
  0x64   :  { %v845_v53 = vpack.c.bf16 %v145_v50, %v143_v49  ;;  %v147_v56 = vld [vmem:[#allocation2 + $0x1c8] sm:$0xff]  ;;  %v153_v63 = vld [vmem:[#allocation2 + $0x1f8] sm:$0xff]  ;;  %v150_v2 = vld [vmem:[#allocation2 + $0x1e0] sm:$0xff] }
  0x65   :  { %820 = vmatpush1.bf16.msra.mxu0 %v819_v44  ;;  %v349_v44 = vld [vmem:[#allocation4 + $0x50] sm:$0xff]  ;;  %v849_v59 = vpack.c.bf16 %v149_v57, %v147_v56  ;;  %v151_v62 = vld [vmem:[#allocation2 + $0x1e8] sm:$0xff]  ;;  %v152_v3 = vld [vmem:[#allocation2 + $0x1f0] sm:$0xff] }
  0x66   :  { %822 = vmatprep.subr.bf16.mxu0 %v821_v45  ;;  %884 = vmatpush3.bf16.msra.mxu1 %v883_v29  ;;  %v350_v45 = vld [vmem:[#allocation4 + $0x58] sm:$0xff]  ;;  %v853_v1 = vpack.c.bf16 %v153_v63, %v151_v62  ;;  %v157_v5 = vld [vmem:[#allocation2 + $0x218] sm:$0xff]  ;;  %v154_v8 = vld [vmem:[#allocation2 + $0x200] sm:$0xff] }
  0x67   :  { %886 = vmatprep.subr.bf16.mxu1 %v885_v32  ;;  %v891_v51 = vpack.c.bf16 %v350_v45, %v349_v44  ;;  %v155_v4 = vld [vmem:[#allocation2 + $0x208] sm:$0xff]  ;;  %v156_v9 = vld [vmem:[#allocation2 + $0x210] sm:$0xff]  ;;  %v87_v12 = vld [vmem:[%s1228_s0] sm:$0xff] }
  0x68   :  { %v857_v7 = vpack.c.bf16 %v157_v5, %v155_v4  ;;  %v159_v10 = vld [vmem:[#allocation2 + $0x228] sm:$0xff]  ;;  %v859_v13 = vpack.c.bf16 %v156_v9, %v154_v8  ;;  %v158_v15 = vld [vmem:[#allocation2 + $0x220] sm:$0xff]  ;;  %v160_v16 = vld [vmem:[#allocation2 + $0x230] sm:$0xff] }
  0x69   :  { %824 = vmatpush1.bf16.msra.mxu0 %v823_v55  ;;  %v144_v55 = vld [vmem:[#allocation2 + $0x1b0] sm:$0xff]  ;;  %v163_v17 = vld [vmem:[#allocation2 + $0x248] sm:$0xff]  ;;  %v863_v19 = vpack.c.bf16 %v160_v16, %v158_v15  ;;  %v162_v22 = vld [vmem:[#allocation2 + $0x240] sm:$0xff] }
  0x6a   :  { %826 = vmatprep.subr.bf16.mxu0 %v825_v60  ;;  %888 = vmatpush3.bf16.msra.mxu1 %v887_v41  ;;  %v847_v58 = vpack.c.bf16 %v144_v55, %v142_v54  ;;  %v146_v60 = vld [vmem:[#allocation2 + $0x1c0] sm:$0xff]  ;;  %v167_v25 = vld [vmem:[#allocation2 + $0x268] sm:$0x3f]  ;;  %v89_v27 = vld [vmem:[%s1228_s0 + $0x10] sm:$0xff]  ;;  %v170_v41 = vlaneseq }
  0x6b   :  { %890 = vmatprep.subr.bf16.mxu1 %v889_v43  ;;  %v851_v0 = vpack.c.bf16 %v148_v61, %v146_v60  ;;  %v166_v26 = vld [vmem:[#allocation2 + $0x260] sm:$0x3f]  ;;  %v367_v28 = vld [vmem:[#allocation4 + $0xe0] sm:$0xff]  ;;  %v368_v29 = vld [vmem:[#allocation4 + $0xe8] sm:$0xff] }
  0x6c   :  { %v351_v31 = vld [vmem:[#allocation4 + $0x60] sm:$0xff]  ;;  %v352_v32 = vld [vmem:[#allocation4 + $0x68] sm:$0xff]  ;;  %v369_v34 = vld [vmem:[#allocation4 + $0xf0] sm:$0xff] }
  0x6d   :  { %828 = vmatpush1.bf16.msra.mxu0 %v827_v6  ;;  %v855_v6 = vpack.c.bf16 %v152_v3, %v150_v2  ;;  %v895_v33 = vpack.c.bf16 %v352_v32, %v351_v31  ;;  %v353_v37 = vld [vmem:[#allocation4 + $0x70] sm:$0xff]  ;;  %v354_v38 = vld [vmem:[#allocation4 + $0x78] sm:$0xff]  ;;  %v455_v62 = vld [vmem:[#allocation6 + $0x20] sm:$0xff] }
  0x6e   :  { %830 = vmatprep.subr.bf16.mxu0 %v829_v11  ;;  %892 = vmatpush3.bf16.msra.mxu1 %v891_v51  ;;  %v161_v11 = vld [vmem:[#allocation2 + $0x238] sm:$0xff]  ;;  %v899_v39 = vpack.c.bf16 %v354_v38, %v353_v37  ;;  %v168_v44 = vld [vmem:[%s1230_s2] sm:$0x3]  ;;  %v458_v2 = vld [vmem:[#allocation6 + $0x38] sm:$0xff] }
  0x6f   :  { %v861_v14 = vpack.c.bf16 %v161_v11, %v159_v10  ;;  %v456_v63 = vld [vmem:[#allocation6 + $0x28] sm:$0xff]  ;;  %v459_v4 = vld [vmem:[#allocation6 + $0x40] sm:$0xff]  ;;  %v462_v8 = vld [vmem:[#allocation6 + $0x58] sm:$0xff] }
  0x70   :  { %v460_v5 = vld [vmem:[#allocation6 + $0x48] sm:$0xff]  ;;  %v463_v10 = vld [vmem:[#allocation6 + $0x60] sm:$0xff] }
  0x71   :  { %832 = vmatpush1.bf16.msra.mxu0 %v831_v18  ;;  %v165_v18 = vld [vmem:[#allocation2 + $0x258] sm:$0xff] }
  0x72   :  { %834 = vmatprep.subr.bf16.mxu0 %v833_v23  ;;  %v865_v21 = vpack.c.bf16 %v165_v18, %v163_v17  ;;  %v164_v23 = vld [vmem:[#allocation2 + $0x250] sm:$0xff]  ;;  %v464_v11 = vld [vmem:[#allocation6 + $0x68] sm:$0xff]  ;;  %v651_v17 = vld [vmem:[%s1232_s4] ss:$0 sm:$0xff] }
  0x73   :  { %v867_v24 = vpack.c.bf16 %v164_v23, %v162_v22  ;;  %v548_v22 = vld [vmem:[#allocation7 + $0x8] sm:$0xff] }
  0x74   :  { %v552_v31 = vld [vmem:[#allocation7 + $0x28] sm:$0xff] }
  0x75   :  { %836 = vmatpush1.bf16.msra.mxu0 %v835_v30  ;;  %v893_v30 = vpack.c.bf16 %v368_v29, %v367_v28  ;;  %v556_v37 = vld [vmem:[#allocation7 + $0x48] sm:$0xff] }
  0x76   :  { %838 = vmatprep.subr.bf16.mxu0 %v837_v35  ;;  %v370_v35 = vld [vmem:[#allocation4 + $0xf8] sm:$0xff] }
  0x77   :  { %894 = vmatprep.subr.bf16.mxu1 %v893_v30  ;;  %v897_v36 = vpack.c.bf16 %v370_v35, %v369_v34  ;;  %v551_v30 = vld [vmem:[#allocation7 + $0x20] sm:$0xff]  ;;  %v554_v34 = vld [vmem:[#allocation7 + $0x38] sm:$0xff] }
  0x78   :  { %896 = vmatpush3.bf16.msra.mxu1 %v895_v33  ;;  %v932_v32 = vpack.c.bf16 %v552_v31, %v551_v30  ;;  %v553_v33 = vld [vmem:[#allocation7 + $0x30] sm:$0xff] }
  0x79   :  { %840 = vmatpush1.bf16.msra.mxu0 %v839_v42  ;;  %898 = vmatprep.subr.bf16.mxu1 %v897_v36  ;;  %v171_v42 = vshrl.u32 %v170_v41, 7  ;;  %v935_v35 = vpack.c.bf16 %v554_v34, %v553_v33  ;;  %v555_v36 = vld [vmem:[#allocation7 + $0x40] sm:$0xff] }
  0x7a   :  { %842 = vmatprep.subr.bf16.mxu0 %v841_v46  ;;  %v938_v38 = vpack.c.bf16 %v556_v37, %v555_v36 }
  0x7b   :  { %v172_v43 = vsub.s32 0, %v171_v42  ;;  %v176_v45 = vsub.s32 1, %v171_v42  ;;  %v559_v42 = vld [vmem:[#allocation7 + $0x60] sm:$0xff] }
  0x7c   :  { %900 = vmatpush3.bf16.msra.mxu1 %v899_v39  ;;  %v558_v39 = vld [vmem:[#allocation7 + $0x58] sm:$0xff] }
  0x7d   :  { %844 = vmatpush1.bf16.msra.mxu0 %v843_v52  ;;  %901 = vmatprep.subr.bf16.mxu1 %v1067_v40  ;;  %v173_v46 = vrot.slane %v168_v44, %v172_v43  ;;  %v177_v47 = vrot.slane %v168_v44, %v176_v45  ;;  %v451_v52 = vld [vmem:[#allocation6] sm:$0xff]  ;;  %v560_v43 = vld [vmem:[#allocation7 + $0x68] sm:$0xff]  ;;  %v561_v45 = vld [vmem:[#allocation7 + $0x70] sm:$0xff] }
  0x7e   :  { %846 = vmatprep.subr.bf16.mxu0 %v845_v53  ;;  %v452_v53 = vld [vmem:[#allocation6 + $0x8] sm:$0xff]  ;;  %v944_v44 = vpack.c.bf16 %v560_v43, %v559_v42 }
  0x7f   :  { %v902_v56 = vpack.c.bf16 %v452_v53, %v451_v52 }
  0x81   :  { %848 = vmatpush1.bf16.msra.mxu0 %v847_v58  ;;  %v453_v58 = vld [vmem:[#allocation6 + $0x10] sm:$0xff] }
  0x82   :  { %850 = vmatprep.subr.bf16.mxu0 %v849_v59  ;;  %v454_v59 = vld [vmem:[#allocation6 + $0x18] sm:$0xff] }
  0x83   :  { %v905_v61 = vpack.c.bf16 %v454_v59, %v453_v58 }
  0x85   :  { %852 = vmatpush1.bf16.msra.mxu0 %v851_v0  ;;  %v908_v0 = vpack.c.bf16 %v456_v63, %v455_v62 }
  0x86   :  { %854 = vmatprep.subr.bf16.mxu0 %v853_v1  ;;  %v457_v1 = vld [vmem:[#allocation6 + $0x30] sm:$0xff] }
  0x87   :  { %v911_v3 = vpack.c.bf16 %v458_v2, %v457_v1 }
  0x89   :  { %856 = vmatpush1.bf16.msra.mxu0 %v855_v6  ;;  %v914_v6 = vpack.c.bf16 %v460_v5, %v459_v4 }
  0x8a   :  { %858 = vmatprep.subr.bf16.mxu0 %v857_v7  ;;  %v461_v7 = vld [vmem:[#allocation6 + $0x50] sm:$0xff] }
  0x8b   :  { %v917_v9 = vpack.c.bf16 %v462_v8, %v461_v7 }
  0x8c   :  { %256 = vmatmul.mubr.f32.vlgmr.msra.gmra.mrb[0].mxu0 %v87_v12  ;;  %v920_v12 = vpack.c.bf16 %v464_v11, %v463_v10 }
  0x8d   :  { %860 = vmatpush1.bf16.msra.mxu0 %v859_v13  ;;  %326 = vmatprep.mubr.f32.mxu0 %v1066_v20  ;;  %v465_v13 = vld [vmem:[#allocation6 + $0x70] sm:$0xff] }
  0x8e   :  { %862 = vmatprep.subr.bf16.mxu0 %v861_v14  ;;  %v466_v14 = vld [vmem:[#allocation6 + $0x78] sm:$0xff] }
  0x8f   :  { %v923_v15 = vpack.c.bf16 %v466_v14, %v465_v13 }
  0x91   :  { %864 = vmatpush1.bf16.msra.mxu0 %v863_v19 }
  0x92   :  { %866 = vmatprep.subr.bf16.mxu0 %v865_v21  ;;  %v547_v21 = vld [vmem:[#allocation7] sm:$0xff] }
  0x95   :  { %868 = vmatpush1.bf16.msra.mxu0 %v867_v24 }
  0x96   :  { %648 = vmatprep.subr.msk.mxu0 %vm184_vm0, %v167_v25  ;;  %v926_v25 = vpack.c.bf16 %v548_v22, %v547_v21 }
  0x99   :  { %649 = vmatpush1.msk.msra.mxu0 %vm184_vm0, %v166_v26  ;;  %v549_v26 = vld [vmem:[#allocation7 + $0x10] sm:$0xff] }
  0x9a   :  { %650 = vmatmul.mubr.msk.f32.vlgmr.msra.gmra.mrb[0].mxu0 %vm180_vm1, %v89_v27  ;;  %v550_v27 = vld [vmem:[#allocation7 + $0x18] sm:$0xff] }
  0x9b   :  { %v929_v29 = vpack.c.bf16 %v550_v27, %v549_v26 }
 0x16d   :  { %v328_v48 = vpop.f32.mrb[0].mxu0 }
 0x16e   :  { %v949_v49 = vadd.f32 %v328_v48, %v173_v46  ;;  %v330_v50 = vpop.f32.mrb[1].mxu0  ;;  %v562_v46 = vld [vmem:[#allocation7 + $0x78] sm:$0xff]  ;;  %v652_v48 = vld [vmem:[%s1234_s6] ss:$0 sm:$0xff] }
 0x16f   :  { %v950_v51 = vadd.f32 %v330_v50, %v177_v47  ;;  %v947_v47 = vpack.c.bf16 %v562_v46, %v561_v45 }
 0x170   :  { %v335_v54 = vmul.f32 0.01, %v949_v49  ;;  %vm333_vm3 = vcmp.gt.f32.partialorder %v949_v49, 0.0 }
 0x171   :  { %vm334_vm2 = vcmp.gt.f32.partialorder %v950_v51, 0.0  ;;  %v336_v55 = vmul.f32 0.01, %v950_v51 }
 0x172   :  { %v337_v60 = vsel %vm333_vm3, %v949_v49, %v335_v54  ;;  %v653_v54 = vld [vmem:[%s1236_s8] ss:$0 sm:$0xff] }
 0x173   :  { %v338_v57 = vsel %vm334_vm2, %v950_v51, %v336_v55 }
 0x174   :  { %442 = vmatprep.mubr.f32.mxu1 %v338_v57 }
 0x175   :  { %443 = vmatmul.mubr.f32.vlgmr.msra.gmra.mrb[0].mxu1 %v337_v60 }
 0x176   :  { %903 = vmatpush3.bf16.msra.mxu1 %v902_v56  ;;  %755 = vmatprep.mubr.msk.f32.mxu1 %vm1068_vm4, %v1066_v20 }
 0x177   :  { %904 = vmatprep.subr.bf16.mxu1 %v1067_v40 }
 0x17a   :  { %906 = vmatpush3.bf16.msra.mxu1 %v905_v61 }
 0x17b   :  { %907 = vmatprep.subr.bf16.mxu1 %v1067_v40 }
 0x17e   :  { %909 = vmatpush3.bf16.msra.mxu1 %v908_v0 }
 0x17f   :  { %910 = vmatprep.subr.bf16.mxu1 %v1067_v40 }
 0x182   :  { %912 = vmatpush3.bf16.msra.mxu1 %v911_v3 }
 0x183   :  { %913 = vmatprep.subr.bf16.mxu1 %v1067_v40 }
 0x186   :  { %915 = vmatpush3.bf16.msra.mxu1 %v914_v6 }
 0x187   :  { %916 = vmatprep.subr.bf16.mxu1 %v1067_v40 }
 0x18a   :  { %918 = vmatpush3.bf16.msra.mxu1 %v917_v9 }
 0x18b   :  { %919 = vmatprep.subr.bf16.mxu1 %v1067_v40 }
 0x18e   :  { %921 = vmatpush3.bf16.msra.mxu1 %v920_v12 }
 0x18f   :  { %922 = vmatprep.subr.bf16.mxu1 %v1067_v40 }
 0x192   :  { %924 = vmatpush3.bf16.msra.mxu1 %v923_v15 }
 0x193   :  { %925 = vmatprep.subr.bf16.mxu1 %v1067_v40 }
 0x248   :  { %v686_v16 = vpop.f32.mrb[0].mxu1 }
 0x249   :  { %v687_v18 = vpop.f32.mrb[1].mxu1 }
 0x24a   :  { %v688_v19 = vadd.f32 %v687_v18, %v686_v16 }
 0x24c   :  { %v445_v23 = vadd.f32 %v688_v19, %v651_v17 }
 0x24e   :  { %v449_v24 = vmul.f32 0.01, %v445_v23  ;;  %vm448_vm5 = vcmp.gt.f32.partialorder %v445_v23, 0.0 }
 0x250   :  { %v450_v28 = vsel %vm448_vm5, %v445_v23, %v449_v24 }
 0x251   :  { %756 = vmatmul.mubr.f32.vlgmr.msra.gmra.mrb[2].mxu1 %v450_v28 }
 0x252   :  { %927 = vmatpush3.bf16.msra.mxu1 %v926_v25  ;;  %790 = vmatprep.mubr.msk.f32.mxu1 %vm1068_vm4, %v1066_v20  ;;  %v557_v20 = vld [vmem:[#allocation7 + $0x50] sm:$0xff] }
 0x253   :  { %928 = vmatprep.subr.bf16.mxu1 %v1067_v40  ;;  %v941_v41 = vpack.c.bf16 %v558_v39, %v557_v20 }
 0x256   :  { %930 = vmatpush3.bf16.msra.mxu1 %v929_v29 }
 0x257   :  { %931 = vmatprep.subr.bf16.mxu1 %v1067_v40 }
 0x25a   :  { %933 = vmatpush3.bf16.msra.mxu1 %v932_v32 }
 0x25b   :  { %934 = vmatprep.subr.bf16.mxu1 %v1067_v40 }
 0x25e   :  { %936 = vmatpush3.bf16.msra.mxu1 %v935_v35 }
 0x25f   :  { %937 = vmatprep.subr.bf16.mxu1 %v1067_v40 }
 0x262   :  { %939 = vmatpush3.bf16.msra.mxu1 %v938_v38 }
 0x263   :  { %940 = vmatprep.subr.bf16.mxu1 %v1067_v40 }
 0x266   :  { %942 = vmatpush3.bf16.msra.mxu1 %v941_v41 }
 0x267   :  { %943 = vmatprep.subr.bf16.mxu1 %v1067_v40 }
 0x26a   :  { %945 = vmatpush3.bf16.msra.mxu1 %v944_v44 }
 0x26b   :  { %946 = vmatprep.subr.bf16.mxu1 %v1067_v40 }
 0x26e   :  { %948 = vmatpush3.bf16.msra.mxu1 %v947_v47 }
 0x324   :  { %v540_v49 = vpop.f32.mrb[2].mxu1 }
 0x325   :  { %v541_v50 = vadd.f32 %v652_v48, %v540_v49  ;;  %v757_v51 = vpop.f32.mrb[3].mxu1 }
 0x327   :  { %vm544_vm6 = vcmp.gt.f32.partialorder %v541_v50, 0.0  ;;  %v545_v52 = vmul.f32 0.01, %v541_v50 }
 0x329   :  { %v546_v53 = vsel %vm544_vm6, %v541_v50, %v545_v52 }
 0x32a   :  { %791 = vmatmul.mubr.f32.vlgmr.msra.gmra.mrb[4].mxu1 %v546_v53 }
 0x3fd   :  { %v636_v40 = vpop.f32.mrb[4].mxu1 }
 0x3fe   :  { %v637_v55 = vadd.f32 %v653_v54, %v636_v40  ;;  %v792_v56 = vpop.f32.mrb[5].mxu1 }
 0x400   :  { %640 = vst [vmem:[%s1237_s9] sm:$0xff] %v637_v55 }
 0x401   :  { %645 = vsyncpa [#allocation3], 1 }
 0x402   :  { %646 = vsyncpa [#allocation5], 1 }
 0x403   :  { %647 = vsyncpa [#allocation8], 1 }

</bundles_post_ra>
